<compile_context>
chip_gen: v6e
topology: v6e:2x2x1
jax: 0.10.0
libtpu: 0.0.40
codegen_flags: <defaults>
</compile_context>

<pallas_src>
import functools

import jax
import jax.numpy as jnp
from jax import lax
from jax.experimental import pallas as pl
from jax.experimental.pallas import tpu as pltpu


def _round_up(x, n):
    return (x + n - 1) // n * n


def two_layer_nn_kernel(x_ref, W_ref, bW_ref, w_ref, bw_ref, o_ref):
    """One batch tile.

    x_ref : (TB, K)      input tile, natural layout (contiguous HBM read)
    W_ref : (M_pad, K)   layer-1 weight (PyTorch (out, in) layout), resident
    bW_ref: (M_pad, 1)   layer-1 bias as a column, resident
    w_ref : (1, M_pad)   layer-2 weight as a row, resident
    bw_ref: (1, 1)       layer-2 bias (SMEM scalar)
    o_ref : (1, TB)      lane-dense output row
    """
    # Layer 1 on the MXU: contract K on both operands -> hT is (M_pad, TB)
    # (hidden on sublanes, batch on lanes) with no physical transpose.
    hT = lax.dot_general(
        W_ref[...], x_ref[...],
        dimension_numbers=(((1,), (1,)), ((), ())),
        preferred_element_type=jnp.float32)
    hT = jnp.maximum(hT + bW_ref[...], 0.0)        # bias column broadcasts over lanes
    # Layer 2 on the MXU as well: (1, M_pad) @ (M_pad, TB) -> (1, TB).
    out = jnp.dot(w_ref[...], hT, preferred_element_type=jnp.float32)
    o_ref[...] = (out + bw_ref[0, 0]).astype(o_ref.dtype)


def two_layer_nn(x, W_weight, W_bias, w_weight, w_bias, *, block_b=2048):
    """x: (B, 2d) f32.  Weights in PyTorch nn.Linear layout:
    W_weight (m, 2d), W_bias (m,), w_weight (1, m), w_bias (1,).
    Returns (B, 1) f32, matching TwoLayerNN.forward.
    """
    B, K = x.shape
    m = W_weight.shape[0]
    f32 = jnp.float32

    # Hidden dim only needs sublane (8) alignment; m=32 means no padding.
    M_pad = _round_up(m, 8)
    # Lane-dense batch tile: always a multiple of 128, clamped for small B.
    TB = _round_up(max(min(block_b, B), 1), 128)
    B_pad = _round_up(B, TB)
    num_tiles = B_pad // TB

    # Inputs stay in natural layout; only pad batch rows if needed.
    x_p = x.astype(f32)
    if B_pad != B:
        x_p = jnp.zeros((B_pad, K), f32).at[:B, :].set(x_p)

    W_p = W_weight.astype(f32)
    bW_col = W_bias.astype(f32).reshape(m, 1)
    w_row = w_weight.astype(f32).reshape(1, m)
    if M_pad != m:  # zero-padded hidden rows contribute nothing (relu(0)*0)
        W_p = jnp.zeros((M_pad, K), f32).at[:m, :].set(W_p)
        bW_col = jnp.zeros((M_pad, 1), f32).at[:m, :].set(bW_col)
        w_row = jnp.zeros((1, M_pad), f32).at[:, :m].set(w_row)
    bw = jnp.asarray(w_bias, f32).reshape(1, 1)

    out_row = pl.pallas_call(
        two_layer_nn_kernel,
        out_shape=jax.ShapeDtypeStruct((1, B_pad), f32),
        grid=(num_tiles,),
        in_specs=[
            pl.BlockSpec((TB, K), lambda i: (i, 0)),        # stream x tiles
            pl.BlockSpec((M_pad, K), lambda i: (0, 0)),     # resident weight
            pl.BlockSpec((M_pad, 1), lambda i: (0, 0)),     # resident bias
            pl.BlockSpec((1, M_pad), lambda i: (0, 0)),     # resident w row
            pl.BlockSpec((1, 1), lambda i: (0, 0),
                         memory_space=pltpu.MemorySpace.SMEM),  # scalar bias
        ],
        out_specs=pl.BlockSpec((1, TB), lambda i: (0, i)),  # lane-dense out
        compiler_params=pltpu.CompilerParams(
            dimension_semantics=("parallel",),  # batch tiles across TCs (v7x)
        ),
    )(x_p, W_p, bW_col, w_row, bw)

    return out_row[0, :B].reshape(B, 1)


# jit the whole wrapper so padding / reshapes fuse and weights are prepared once
# per compiled shape rather than per call.
two_layer_nn_jit = jax.jit(two_layer_nn, static_argnames=("block_b",))


if __name__ == "__main__":
    d = 10   # as in the reference script
    m = 32   # hidden width
    B = 8    # batch

    key = jax.random.PRNGKey(0)
    kx, kW, kbW, kw, kbw = jax.random.split(key, 5)

    # nn.Linear-shaped parameters:
    #   self.W = nn.Linear(2*d, m): weight (m, 2d), bias (m,)
    #   self.w = nn.Linear(m, 1):   weight (1, m),  bias (1,)
    W_weight = jax.random.normal(kW, (m, 2 * d), dtype=jnp.float32) * 0.1
    W_bias = jax.random.normal(kbW, (m,), dtype=jnp.float32) * 0.1
    w_weight = jax.random.normal(kw, (1, m), dtype=jnp.float32) * 0.1
    w_bias = jax.random.normal(kbw, (1,), dtype=jnp.float32) * 0.1

    x = jax.random.normal(kx, (B, 2 * d), dtype=jnp.float32)

    out = two_layer_nn_jit(x, W_weight, W_bias, w_weight, w_bias)
    out = jax.block_until_ready(out)

    # Reference: same math as TwoLayerNN.forward, in plain JAX.
    ref = jnp.maximum(x @ W_weight.T + W_bias, 0.0) @ w_weight.T + w_bias
    assert out.shape == (B, 1), out.shape
    assert jnp.allclose(out, ref, atol=1e-5, rtol=1e-5), float(
        jnp.max(jnp.abs(out - ref)))

    print("KERNEL_OK")
</pallas_src>

<mosaic_0001>
module attributes {stable_mosaic.version = 11 : i64} {
  func.func @two_layer_nn_kernel(%arg0: i32, %arg1: memref<128x20xf32, #tpu.memory_space<vmem>>, %arg2: memref<32x20xf32, #tpu.memory_space<vmem>>, %arg3: memref<32x1xf32, #tpu.memory_space<vmem>>, %arg4: memref<1x32xf32, #tpu.memory_space<vmem>>, %arg5: memref<1x1xf32, #tpu.memory_space<smem>>, %arg6: memref<1x128xf32, #tpu.memory_space<vmem>>) attributes {dimension_semantics = [#tpu.dimension_semantics<parallel>], iteration_bounds = array<i64: 1>, scalar_prefetch = 0 : i64, scratch_operands = 0 : i64, tpu.core_type = #tpu.core_type<tc>, window_params = [{transform_indices = @transform_0, window_bounds = array<i64: 128, 20>}, {pipeline_mode = #tpu.pipeline_mode<synchronous>, transform_indices = @transform_1, window_bounds = array<i64: 32, 20>}, {pipeline_mode = #tpu.pipeline_mode<synchronous>, transform_indices = @transform_2, window_bounds = array<i64: 32, 1>}, {pipeline_mode = #tpu.pipeline_mode<synchronous>, transform_indices = @transform_3, window_bounds = array<i64: 1, 32>}, {transform_indices = @transform_4, window_bounds = array<i64: 1, 1>}, {transform_indices = @transform_5, window_bounds = array<i64: 1, 128>}]} {
    %c0 = arith.constant 0 : index
    %c0_0 = arith.constant 0 : index
    %0 = vector.load %arg2[%c0, %c0_0] : memref<32x20xf32, #tpu.memory_space<vmem>>, vector<32x20xf32>
    %c0_1 = arith.constant 0 : index
    %c0_2 = arith.constant 0 : index
    %1 = vector.load %arg1[%c0_1, %c0_2] : memref<128x20xf32, #tpu.memory_space<vmem>>, vector<128x20xf32>
    %cst = arith.constant dense<0.000000e+00> : vector<32x128xf32>
    %2 = tpu.matmul %0, %1, %cst {dimension_numbers = #tpu.dot_dimension_numbers<[1], [1], [0], [0], [0, 0, 1, 0], [], []>} : vector<32x20xf32>, vector<128x20xf32>, vector<32x128xf32> -> vector<32x128xf32>
    %c0_3 = arith.constant 0 : index
    %c0_4 = arith.constant 0 : index
    %3 = vector.load %arg3[%c0_3, %c0_4] : memref<32x1xf32, #tpu.memory_space<vmem>>, vector<32x1xf32>
    %4 = vector.broadcast %3 : vector<32x1xf32> to vector<32x128xf32>
    %5 = arith.addf %2, %4 : vector<32x128xf32>
    %cst_5 = arith.constant 0.000000e+00 : f32
    %6 = vector.broadcast %cst_5 : f32 to vector<32x128xf32>
    %7 = arith.maximumf %5, %6 : vector<32x128xf32>
    %c0_6 = arith.constant 0 : index
    %c0_7 = arith.constant 0 : index
    %8 = vector.load %arg4[%c0_6, %c0_7] : memref<1x32xf32, #tpu.memory_space<vmem>>, vector<1x32xf32>
    %cst_8 = arith.constant dense<0.000000e+00> : vector<1x128xf32>
    %9 = tpu.matmul %8, %7, %cst_8 {dimension_numbers = #tpu.dot_dimension_numbers<[1], [0], [0], [1], [0, 0, 1, 1], [], []>} : vector<1x32xf32>, vector<32x128xf32>, vector<1x128xf32> -> vector<1x128xf32>
    %c0_9 = arith.constant 0 : index
    %c0_10 = arith.constant 0 : index
    %10 = memref.load %arg5[%c0_9, %c0_10] : memref<1x1xf32, #tpu.memory_space<smem>>
    %11 = vector.broadcast %10 : f32 to vector<1x128xf32>
    %12 = arith.addf %9, %11 : vector<1x128xf32>
    %c0_11 = arith.constant 0 : index
    %c0_12 = arith.constant 0 : index
    %13 = vector.load %arg6[%c0_11, %c0_12] : memref<1x128xf32, #tpu.memory_space<vmem>>, vector<1x128xf32>
    tpu.vector_store %arg6[%c0_11, %c0_12], %12 {strides = array<i32>} : memref<1x128xf32, #tpu.memory_space<vmem>>, vector<1x128xf32>,
    return
  }
  func.func @transform_0(%arg0: i32) -> (i32, i32) {
    %c0_i32 = arith.constant 0 : i32
    %c0_i32_0 = arith.constant 0 : i32
    return %arg0, %c0_i32 : i32, i32
  }
  func.func @transform_1(%arg0: i32) -> (i32, i32) {
    %c0_i32 = arith.constant 0 : i32
    %c0_i32_0 = arith.constant 0 : i32
    %c0_i32_1 = arith.constant 0 : i32
    return %c0_i32, %c0_i32_0 : i32, i32
  }
  func.func @transform_2(%arg0: i32) -> (i32, i32) {
    %c0_i32 = arith.constant 0 : i32
    %c0_i32_0 = arith.constant 0 : i32
    %c0_i32_1 = arith.constant 0 : i32
    return %c0_i32, %c0_i32_0 : i32, i32
  }
  func.func @transform_3(%arg0: i32) -> (i32, i32) {
    %c0_i32 = arith.constant 0 : i32
    %c0_i32_0 = arith.constant 0 : i32
    %c0_i32_1 = arith.constant 0 : i32
    return %c0_i32, %c0_i32_0 : i32, i32
  }
  func.func @transform_4(%arg0: i32) -> (i32, i32) {
    %c0_i32 = arith.constant 0 : i32
    %c0_i32_0 = arith.constant 0 : i32
    %c0_i32_1 = arith.constant 0 : i32
    return %c0_i32, %c0_i32_0 : i32, i32
  }
  func.func @transform_5(%arg0: i32) -> (i32, i32) {
    %c0_i32 = arith.constant 0 : i32
    %c0_i32_0 = arith.constant 0 : i32
    return %c0_i32, %arg0 : i32, i32
  }
}

</mosaic_0001>

<bundles_post_ra>
// kernel: two_layer_nn.1
= control target key start
LH: loop header
LB: loop body
LE: loop exit
PB: predicated region body
PF: predicated region fallthrough
CT: control target
= control target key end

     0   :  { %vm65_vm0 = vcmask 162816   ;;  %v397_v2 = vmov 0   ;;  %v398_v25 = vmov 0.0   ;;  %vm399_vm1 = vmmov 0   ;;  %s547_s0 = inlined_call_operand.vmem [shape: f32[128,20], index: 0, kind: input, shape index: {}]   ;;  %s548_s1 = inlined_call_operand.vmem [shape: f32[32,20], index: 1, kind: input, shape index: {}]   ;;  %s549_s2 = inlined_call_operand.vmem [shape: f32[32,1], index: 2, kind: input, shape index: {}]   ;;  %s550_s3 = inlined_call_operand.vmem [shape: f32[1,32], index: 3, kind: input, shape index: {}]   ;;  %s551_s4 = inlined_call_operand.<no memory space> [shape: f32[1,1], index: 4, kind: input, shape index: {}]   ;;  %s552_s5 = inlined_call_operand.vmem [shape: f32[1,128], index: 5, kind: output, shape index: {}]  }
   0x1   :  { %v40_v0 = vld [vmem:[%s547_s0 + $0x78] sm:$0xff]  ;;  %v39_v1 = vld [vmem:[%s547_s0 + $0x70] sm:$0xff]  ;;  %396 = vset.pattern.permute.xlu1 %v397_v2  ;;  %395 = vset.pattern.permute.xlu0 %v397_v2  ;;  %v38_v3 = vld [vmem:[%s547_s0 + $0x68] sm:$0xff]  ;;  %vm218_vm2 = vcmask 261120   ;;  %v217_v43 = vstv %s551_s4 }
   0x2   :  { %343 = vmatprep.subr.msk.mxu0 %vm65_vm0, %v40_v0  ;;  %v21_v4 = vld [vmem:[%s548_s1] sm:$0xff]  ;;  %v44_v5 = vld [vmem:[%s549_s2 + $0x18] sm:$0xff]  ;;  %v42_v6 = vld [vmem:[%s549_s2 + $0x8] sm:$0xff]  ;;  %381 = vmatprep.subr.mxu1 %v398_v25 }
   0x3   :  { %344 = vmatpush3.xpose.msk.msra.mxu0 %vm65_vm0, %v40_v0  ;;  %375 = vmatprep.mubr.msk.f32.mxu0 %vm65_vm0, %v21_v4  ;;  %v37_v7 = vld [vmem:[%s547_s0 + $0x60] sm:$0xff]  ;;  %v43_v8 = vld [vmem:[%s549_s2 + $0x10] sm:$0xff]  ;;  %v36_v10 = vld [vmem:[%s547_s0 + $0x58] sm:$0xff] }
   0x4   :  { %345 = vmatprep.subr.msk.mxu0 %vm65_vm0, %v39_v1  ;;  %62 = vperm.xlu0 %395, %v44_v5   ;;  %v41_v9 = vld [vmem:[%s549_s2] sm:$0xff]  ;;  %v35_v11 = vld [vmem:[%s547_s0 + $0x50] sm:$0xff]  ;;  %v34_v12 = vld [vmem:[%s547_s0 + $0x48] sm:$0xff] }
   0x5   :  { %52 = vperm.xlu1 %396, %v42_v6   ;;  %v33_v13 = vld [vmem:[%s547_s0 + $0x40] sm:$0xff]  ;;  %v32_v14 = vld [vmem:[%s547_s0 + $0x38] sm:$0xff]  ;;  %v31_v15 = vld [vmem:[%s547_s0 + $0x30] sm:$0xff]  ;;  %389 = vmatprep.mubr.msk.f32.mxu1 %vm399_vm1, %v398_v25 }
   0x6   :  { %v30_v16 = vld [vmem:[%s547_s0 + $0x28] sm:$0xff]  ;;  %v29_v17 = vld [vmem:[%s547_s0 + $0x20] sm:$0xff]  ;;  %v28_v18 = vld [vmem:[%s547_s0 + $0x18] sm:$0xff] }
   0x7   :  { %346 = vmatpush3.xpose.msk.msra.mxu0 %vm65_vm0, %v39_v1  ;;  %v27_v19 = vld [vmem:[%s547_s0 + $0x10] sm:$0xff]  ;;  %v26_v20 = vld [vmem:[%s547_s0 + $0x8] sm:$0xff]  ;;  %v25_v21 = vld [vmem:[%s547_s0] sm:$0xff] }
   0x8   :  { %347 = vmatprep.subr.msk.mxu0 %vm65_vm0, %v38_v3  ;;  %57 = vperm.xlu0 %395, %v43_v8   ;;  %v22_v22 = vld [vmem:[%s548_s1 + $0x8] sm:$0xff]  ;;  %v23_v23 = vld [vmem:[%s548_s1 + $0x10] sm:$0xff]  ;;  %v24_v24 = vld [vmem:[%s548_s1 + $0x18] sm:$0xff] }
   0x9   :  { %47 = vperm.xlu1 %396, %v41_v9   ;;  %v215_v42 = vld [vmem:[%s550_s3] sm:$0x1] }
   0xb   :  { %348 = vmatpush3.xpose.msk.msra.mxu0 %vm65_vm0, %v38_v3 }
   0xc   :  { %349 = vmatprep.subr.msk.mxu0 %vm65_vm0, %v37_v7 }
   0xf   :  { %350 = vmatpush3.xpose.msk.msra.mxu0 %vm65_vm0, %v37_v7 }
  0x10   :  { %351 = vmatprep.subr.msk.mxu0 %vm65_vm0, %v36_v10 }
  0x13   :  { %352 = vmatpush3.xpose.msk.msra.mxu0 %vm65_vm0, %v36_v10 }
  0x14   :  { %353 = vmatprep.subr.msk.mxu0 %vm65_vm0, %v35_v11 }
  0x17   :  { %354 = vmatpush3.xpose.msk.msra.mxu0 %vm65_vm0, %v35_v11 }
  0x18   :  { %355 = vmatprep.subr.msk.mxu0 %vm65_vm0, %v34_v12 }
  0x1b   :  { %356 = vmatpush3.xpose.msk.msra.mxu0 %vm65_vm0, %v34_v12 }
  0x1c   :  { %357 = vmatprep.subr.msk.mxu0 %vm65_vm0, %v33_v13 }
  0x1f   :  { %358 = vmatpush3.xpose.msk.msra.mxu0 %vm65_vm0, %v33_v13 }
  0x20   :  { %359 = vmatprep.subr.msk.mxu0 %vm65_vm0, %v32_v14 }
  0x23   :  { %360 = vmatpush3.xpose.msk.msra.mxu0 %vm65_vm0, %v32_v14 }
  0x24   :  { %361 = vmatprep.subr.msk.mxu0 %vm65_vm0, %v31_v15 }
  0x27   :  { %362 = vmatpush3.xpose.msk.msra.mxu0 %vm65_vm0, %v31_v15 }
  0x28   :  { %363 = vmatprep.subr.msk.mxu0 %vm65_vm0, %v30_v16 }
  0x2b   :  { %364 = vmatpush3.xpose.msk.msra.mxu0 %vm65_vm0, %v30_v16 }
  0x2c   :  { %365 = vmatprep.subr.msk.mxu0 %vm65_vm0, %v29_v17 }
  0x2f   :  { %366 = vmatpush3.xpose.msk.msra.mxu0 %vm65_vm0, %v29_v17 }
  0x30   :  { %367 = vmatprep.subr.msk.mxu0 %vm65_vm0, %v28_v18 }
  0x33   :  { %368 = vmatpush3.xpose.msk.msra.mxu0 %vm65_vm0, %v28_v18 }
  0x34   :  { %369 = vmatprep.subr.msk.mxu0 %vm65_vm0, %v27_v19 }
  0x37   :  { %370 = vmatpush3.xpose.msk.msra.mxu0 %vm65_vm0, %v27_v19 }
  0x38   :  { %371 = vmatprep.subr.msk.mxu0 %vm65_vm0, %v26_v20 }
  0x3b   :  { %372 = vmatpush3.xpose.msk.msra.mxu0 %vm65_vm0, %v26_v20 }
  0x3c   :  { %373 = vmatprep.subr.msk.mxu0 %vm65_vm0, %v25_v21 }
  0x3f   :  { %374 = vmatpush3.xpose.msk.msra.mxu0 %vm65_vm0, %v25_v21 }
  0x42   :  { %376 = vmatmul.mubr.msk.f32.vlgmr.msra.gmra.mxu0 %vm65_vm0, %v22_v22 }
  0x43   :  { %378 = vmatprep.mubr.msk.f32.mxu0 %vm65_vm0, %v23_v23 }
  0x46   :  { %379 = vmatmul.mubr.msk.f32.gmra.mxu0 %vm65_vm0, %v24_v24 }
  0x7f   :  { %v63_v26 = vpop.permute.xlu0 %62 }
  0x80   :  { %v53_v27 = vpop.permute.xlu1 %52 }
  0x83   :  { %v58_v31 = vpop.permute.xlu0 %57 }
  0x84   :  { %v48_v33 = vpop.permute.xlu1 %47 }
 0x102   :  { %v377_v28 = vpop.f32.mrf.mxu0 }
 0x103   :  { %v198_v35 = vadd.f32 %v377_v28, %v53_v27 }
 0x104   :  { %v192_v29 = vpop.f32.mrf.mxu0 }
 0x105   :  { %v193_v38 = vadd.f32 %v192_v29, %v48_v33  ;;  %v212_v40 = vmax.f32 %v198_v35, 0.0 }
 0x106   :  { %v380_v30 = vpop.f32.mrf.mxu0 }
 0x107   :  { %v208_v32 = vadd.f32 %v380_v30, %v63_v26  ;;  %v211_v41 = vmax.f32 %v193_v38, 0.0 }
 0x108   :  { %v202_v34 = vpop.f32.mrf.mxu0 }
 0x109   :  { %v214_v36 = vmax.f32 %v208_v32, 0.0  ;;  %v203_v37 = vadd.f32 %v202_v34, %v58_v31 }
 0x10b   :  { %v213_v39 = vmax.f32 %v203_v37, 0.0  ;;  %382 = vmatpush3.msra.mxu1 %v214_v36 }
 0x10c   :  { %383 = vmatprep.subr.mxu1 %v398_v25 }
 0x10d   :  { %384 = vmatpush3.msra.mxu1 %v213_v39 }
 0x10e   :  { %385 = vmatprep.subr.mxu1 %v398_v25 }
 0x10f   :  { %386 = vmatpush3.msra.mxu1 %v212_v40 }
 0x110   :  { %387 = vmatprep.subr.mxu1 %v398_v25 }
 0x111   :  { %388 = vmatpush3.msra.mxu1 %v211_v41 }
 0x112   :  { %390 = vmatmul.mubr.msk.f32.vlgmr.msra.gmra.mxu1 %vm218_vm2, %v215_v42 }
 0x1d2   :  { %v288_v44 = vpop.f32.mrf.mxu1 }
 0x1d3   :  { %v289_v45 = vadd.f32 %v288_v44, %v217_v43 }
 0x1d4   :  { %v391_v46 = vpop.f32.mrf.mxu1 }
 0x1d5   :  { %292 = vst [vmem:[%s552_s5] sm:$0x1] %v289_v45 }

</bundles_post_ra>
